<compile_context>
chip_gen: v6e
topology: v6e:2x2x1
jax: 0.10.0
libtpu: 0.0.40
codegen_flags: <defaults>
</compile_context>

<pallas_src>
import numpy as np
import jax
import jax.numpy as jnp
from jax.experimental import pallas as pl
from jax.experimental.pallas import tpu as pltpu

LANE = 128
SUBLANE = 8
VMEM_BUDGET = 24 << 20  # per-step double-buffered working-set cap (fits all chips)


def _make_sum_kernel(weights):
    """Build a kernel summing n same-shape tiles with static per-source weights.

    `weights` is a tuple of Python floats; weights[0] is always 1.0.
    """
    n = len(weights)

    def kernel(*refs):
        x_refs, o_ref = refs[:n], refs[n]
        # Accumulate in float32 regardless of the input dtype.
        acc = x_refs[0][...].astype(jnp.float32)
        for i in range(1, n):  # n is static -> unrolled at trace time
            xi = x_refs[i][...].astype(jnp.float32)
            w = weights[i]
            if w == 1.0:
                acc = acc + xi
            else:
                acc = acc + xi * jnp.float32(w)
        o_ref[...] = acc.astype(o_ref.dtype)

    return kernel


def sum_forward(xs, weight=False):
    """Pallas equivalent of Sum(n, weight).forward(xs)."""
    n = len(xs)
    orig_shape = xs[0].shape
    dtype = xs[0].dtype
    total = int(np.prod(orig_shape))

    # Static per-source weights (module __init__: w = -arange(1, n)/2).
    if weight and n > 1:
        w_param = -np.arange(1.0, n, dtype=np.float64) / 2.0
        w_vals = 2.0 / (1.0 + np.exp(-w_param))           # sigmoid(w) * 2
        weights = (1.0,) + tuple(float(v) for v in w_vals)
    else:
        weights = (1.0,) * n

    # Flatten each input to a lane-dense (rows, 128) view. The reshape is
    # metadata-only for contiguous inputs; pad only if strictly required.
    pad = (-total) % LANE
    rows = (total + pad) // LANE

    def to_rows(x):
        xf = x.reshape(-1)
        if pad:
            xf = jnp.pad(xf, (0, pad))
        return xf.reshape(rows, LANE)

    xfs = [to_rows(x) for x in xs]

    # Row-tile size: as large as possible while keeping the double-buffered
    # (n inputs + 1 output) working set under VMEM_BUDGET.
    dtype_bytes = jnp.dtype(dtype).itemsize
    bytes_per_row = (n + 1) * 2 * LANE * dtype_bytes
    tr_cap = max(SUBLANE, (VMEM_BUDGET // bytes_per_row) // SUBLANE * SUBLANE)
    TR = int(min(1024, tr_cap))
    if TR >= rows:
        TR = rows                                   # single full-extent block
    else:
        TR = max(SUBLANE, (TR // SUBLANE) * SUBLANE)  # multiple of 8; ragged last
                                                      # block is masked by Pallas
    grid = (pl.cdiv(rows, TR),)

    block = pl.BlockSpec((TR, LANE), lambda i: (i, 0))
    vmem_limit = int(
        min(max((n + 1) * 2 * TR * LANE * dtype_bytes + (4 << 20), 16 << 20),
            48 << 20)
    )

    out = pl.pallas_call(
        _make_sum_kernel(weights),
        out_shape=jax.ShapeDtypeStruct((rows, LANE), dtype),
        grid_spec=pl.GridSpec(
            grid=grid,
            in_specs=[block] * n,
            out_specs=block,
        ),
        compiler_params=pltpu.CompilerParams(
            dimension_semantics=("parallel",),   # lets v7x shard steps across TCs
            vmem_limit_bytes=vmem_limit,
        ),
    )(*xfs)

    y = out.reshape(-1)
    if pad:
        y = y[:total]
    return y.reshape(orig_shape)


def _reference(xs, weight=False):
    n = len(xs)
    y = xs[0]
    if weight and n > 1:
        w = jax.nn.sigmoid(-jnp.arange(1.0, n, dtype=jnp.float32) / 2.0) * 2.0
        for i in range(n - 1):
            y = y + xs[i + 1] * w[i]
    else:
        for i in range(n - 1):
            y = y + xs[i + 1]
    return y


if __name__ == "__main__":
    key = jax.random.PRNGKey(0)
    n = 3
    shape = (2, 4, 16, 16)                          # NCHW, small
    keys = jax.random.split(key, n)
    xs = [jax.random.normal(k, shape, dtype=jnp.float32) for k in keys]

    # Unweighted
    y0 = sum_forward(xs, weight=False)
    jax.block_until_ready(y0)
    ref0 = _reference(xs, weight=False)
    np.testing.assert_allclose(np.asarray(y0), np.asarray(ref0), rtol=1e-5, atol=1e-5)

    # Weighted (w = -arange(1, n)/2, as in the module's __init__)
    y1 = sum_forward(xs, weight=True)
    jax.block_until_ready(y1)
    ref1 = _reference(xs, weight=True)
    np.testing.assert_allclose(np.asarray(y1), np.asarray(ref1), rtol=1e-5, atol=1e-5)

    # Non-lane-aligned shape to exercise the padding / ragged-block path.
    shape2 = (2, 3, 7, 5)
    keys2 = jax.random.split(jax.random.PRNGKey(1), n)
    xs2 = [jax.random.normal(k, shape2, dtype=jnp.float32) for k in keys2]
    y2 = sum_forward(xs2, weight=True)
    jax.block_until_ready(y2)
    ref2 = _reference(xs2, weight=True)
    np.testing.assert_allclose(np.asarray(y2), np.asarray(ref2), rtol=1e-5, atol=1e-5)

    print("KERNEL_OK")
</pallas_src>

<mosaic_0001>
module attributes {stable_mosaic.version = 11 : i64} {
  func.func @kernel(%arg0: i32, %arg1: memref<16x128xf32, #tpu.memory_space<vmem>>, %arg2: memref<16x128xf32, #tpu.memory_space<vmem>>, %arg3: memref<16x128xf32, #tpu.memory_space<vmem>>, %arg4: memref<16x128xf32, #tpu.memory_space<vmem>>) attributes {dimension_semantics = [#tpu.dimension_semantics<parallel>], iteration_bounds = array<i64: 1>, scalar_prefetch = 0 : i64, scratch_operands = 0 : i64, tpu.core_type = #tpu.core_type<tc>, window_params = [{transform_indices = @transform_0, window_bounds = array<i64: 16, 128>}, {transform_indices = @transform_1, window_bounds = array<i64: 16, 128>}, {transform_indices = @transform_2, window_bounds = array<i64: 16, 128>}, {transform_indices = @transform_3, window_bounds = array<i64: 16, 128>}]} {
    %c0 = arith.constant 0 : index
    %c0_0 = arith.constant 0 : index
    %0 = vector.load %arg1[%c0, %c0_0] : memref<16x128xf32, #tpu.memory_space<vmem>>, vector<16x128xf32>
    %c0_1 = arith.constant 0 : index
    %c0_2 = arith.constant 0 : index
    %1 = vector.load %arg2[%c0_1, %c0_2] : memref<16x128xf32, #tpu.memory_space<vmem>>, vector<16x128xf32>
    %2 = arith.addf %0, %1 : vector<16x128xf32>
    %c0_3 = arith.constant 0 : index
    %c0_4 = arith.constant 0 : index
    %3 = vector.load %arg3[%c0_3, %c0_4] : memref<16x128xf32, #tpu.memory_space<vmem>>, vector<16x128xf32>
    %4 = arith.addf %2, %3 : vector<16x128xf32>
    %c0_5 = arith.constant 0 : index
    %c0_6 = arith.constant 0 : index
    %5 = vector.load %arg4[%c0_5, %c0_6] : memref<16x128xf32, #tpu.memory_space<vmem>>, vector<16x128xf32>
    tpu.vector_store %arg4[%c0_5, %c0_6], %4 {strides = array<i32>} : memref<16x128xf32, #tpu.memory_space<vmem>>, vector<16x128xf32>,
    return
  }
  func.func @transform_0(%arg0: i32) -> (i32, i32) {
    %c0_i32 = arith.constant 0 : i32
    %c0_i32_0 = arith.constant 0 : i32
    return %arg0, %c0_i32 : i32, i32
  }
  func.func @transform_1(%arg0: i32) -> (i32, i32) {
    %c0_i32 = arith.constant 0 : i32
    %c0_i32_0 = arith.constant 0 : i32
    return %arg0, %c0_i32 : i32, i32
  }
  func.func @transform_2(%arg0: i32) -> (i32, i32) {
    %c0_i32 = arith.constant 0 : i32
    %c0_i32_0 = arith.constant 0 : i32
    return %arg0, %c0_i32 : i32, i32
  }
  func.func @transform_3(%arg0: i32) -> (i32, i32) {
    %c0_i32 = arith.constant 0 : i32
    %c0_i32_0 = arith.constant 0 : i32
    return %arg0, %c0_i32 : i32, i32
  }
}

</mosaic_0001>

<bundles_post_ra>
// kernel: tpu_custom_call.1
= control target key start
LH: loop header
LB: loop body
LE: loop exit
PB: predicated region body
PF: predicated region fallthrough
CT: control target
= control target key end

     0   :  { %8 = vsyncpa [#allocation3], 0  ;;  %s228_s0 = inlined_call_operand.hbm [shape: f32[16,128], index: 0, kind: input, shape index: {}]   ;;  %s229_s1 = inlined_call_operand.hbm [shape: f32[16,128], index: 1, kind: input, shape index: {}]   ;;  %s230_s2 = inlined_call_operand.hbm [shape: f32[16,128], index: 2, kind: input, shape index: {}]   ;;  %s231_s3 = inlined_call_operand.hbm [shape: f32[16,128], index: 3, kind: output, shape index: {}]  }
   0x1   :  { %9 = vsyncpa [#allocation6], 0 }
   0x2   :  { %10 = vsyncpa [#allocation4], 0  ;;  %s178_s12 = smov [#allocation5]   ;;  %s179_s14 = smov [#allocation2]  }
   0x3   :  { %s28_s13 = sshll.u32 %s178_s12, 4  ;;  %s16_s15 = sshll.u32 %s179_s14, 4  ;;  %s29_s13 = int_to_ptr.vmem [resolvable:$true] %s28_s13  ;;  %s17_s15 = int_to_ptr.vmem [resolvable:$true] %s16_s15 }
   0x4   :  { %s100_s16 = scalar_lea.vmem %s29_s13, 256  ;;  %p105_p1 = scmp.lt.s32.totalorder %s29_s13, %s29_s13 }
   0x5   :  { %p101_p0 = scmp.ne.s32.totalorder %s29_s13, %s100_s16  ;;  %p106_p2 = scmp.lt.s32.totalorder %s100_s16, %s100_s16 }
   0x7   :  { %p107_p3 = por %p106_p2, %p105_p1 }
   0x9   :  { %p108_p4 = pnand %p107_p3, %p101_p0 }
   0xb   :  { %111 = shalt.err (!%p108_p4)
}
   0xc   :  { %s180_s17 = smov 128   ;;  %s181_s18 = smov 8  }
   0xd   :  { %34 = dma.hbm_to_vmem [thread:$0]  %s229_s1, 256, %s29_s13, [#allocation6], %s180_s17, %s180_s17, %s181_s18  }
   0xe   :  { %s120_s21 = scalar_lea.vmem %s17_s15, 256  ;;  %p125_p6 = scmp.lt.s32.totalorder %s17_s15, %s17_s15 }
   0xf   :  { %p121_p5 = scmp.ne.s32.totalorder %s17_s15, %s120_s21  ;;  %p126_p7 = scmp.lt.s32.totalorder %s120_s21, %s120_s21 }
  0x11   :  { %p127_p8 = por %p126_p7, %p125_p6 }
  0x13   :  { %p128_p9 = pnand %p127_p8, %p121_p5 }
  0x15   :  { %131 = shalt.err (!%p128_p9)
}
  0x16   :  { %22 = dma.hbm_to_vmem [thread:$0]  %s228_s0, 256, %s17_s15, [#allocation3], %s180_s17, %s180_s17, %s181_s18  }
  0x17   :  { %s182_s24 = smov [#allocation7]  }
  0x18   :  { %s40_s25 = sshll.u32 %s182_s24, 4  ;;  %s41_s25 = int_to_ptr.vmem [resolvable:$true] %s40_s25 }
  0x19   :  { %s140_s26 = scalar_lea.vmem %s41_s25, 256  ;;  %p145_p11 = scmp.lt.s32.totalorder %s41_s25, %s41_s25 }
  0x1a   :  { %p141_p10 = scmp.ne.s32.totalorder %s41_s25, %s140_s26  ;;  %p146_p12 = scmp.lt.s32.totalorder %s140_s26, %s140_s26 }
  0x1c   :  { %p147_p13 = por %p146_p12, %p145_p11 }
  0x1e   :  { %p148_p0 = pnand %p147_p13, %p141_p10 }
  0x20   :  { %151 = shalt.err (!%p148_p0)
}
  0x21   :  { %46 = dma.hbm_to_vmem [thread:$0]  %s230_s2, 256, %s41_s25, [#allocation6], %s180_s17, %s180_s17, %s181_s18  }
  0x22   :  { %172 = dma.done.wait [#allocation3], 256  }
  0x23   :  { %173 = vsyncadd [#allocation3], 4294967040 }
  0x24   :  { %174 = dma.done.wait [#allocation6], 512  }
  0x25   :  { %175 = vsyncadd [#allocation6], 4294966784  ;;  %v56_v0 = vld [vmem:[#allocation2] sm:$0xff]  ;;  %v58_v1 = vld [vmem:[#allocation5] sm:$0xff]  ;;  %s183_s0 = smov [#allocation8]  }
  0x26   :  { %v62_v2 = vld [vmem:[#allocation7] sm:$0xff]  ;;  %v60_v3 = vadd.f32 %v58_v1, %v56_v0  ;;  %v57_v4 = vld [vmem:[#allocation2 + $0x8] sm:$0xff]  ;;  %v59_v5 = vld [vmem:[#allocation5 + $0x8] sm:$0xff]  ;;  %s73_s28 = sshll.u32 %s183_s0, 4  ;;  %s74_s28 = int_to_ptr.vmem [resolvable:$true] %s73_s28 }
  0x27   :  { %v63_v6 = vld [vmem:[#allocation7 + $0x8] sm:$0xff]  ;;  %v61_v7 = vadd.f32 %v59_v5, %v57_v4  ;;  %s152_s2 = scalar_lea.vmem %s74_s28, 256  ;;  %p157_p2 = scmp.lt.s32.totalorder %s74_s28, %s74_s28 }
  0x28   :  { %v64_v8 = vadd.f32 %v62_v2, %v60_v3  ;;  %p153_p1 = scmp.ne.s32.totalorder %s74_s28, %s152_s2  ;;  %p158_p3 = scmp.lt.s32.totalorder %s152_s2, %s152_s2 }
  0x29   :  { %v65_v9 = vadd.f32 %v63_v6, %v61_v7 }
  0x2a   :  { %66 = vst [vmem:[#allocation8] sm:$0xff] %v64_v8  ;;  %p159_p4 = por %p158_p3, %p157_p2 }
  0x2b   :  { %67 = vst [vmem:[#allocation8 + $0x8] sm:$0xff] %v65_v9 }
  0x2c   :  { %p160_p5 = pnand %p159_p4, %p153_p1 }
  0x2e   :  { %163 = shalt.err (!%p160_p5)
}
  0x2f   :  { %79 = dma.vmem_to_hbm [thread:$0]  %s74_s28, 256, %s231_s3, [#allocation4], %s180_s17, %s180_s17, %s181_s18  }
  0x30   :  { %176 = dma.done.wait [#allocation4], 256  }
  0x31   :  { %177 = vsyncadd [#allocation4], 4294967040 }
  0x32   :  { %83 = vsyncpa [#allocation3], 1 }
  0x33   :  { %84 = vsyncpa [#allocation6], 1 }
  0x34   :  { %85 = vsyncpa [#allocation4], 1 }

</bundles_post_ra>
